<compile_context>
chip_gen: v5e
topology: v5e:2x2
jax: 0.10.0
libtpu: 0.0.40
codegen_flags: <defaults>
</compile_context>

<pallas_src>
import math

import numpy as np
import jax
import jax.numpy as jnp
from jax.experimental import pallas as pl
from jax.experimental.pallas import tpu as pltpu


def _round_up(a, b):
    return -(-a // b) * b


def _vmem_capacity_bytes():
    try:
        return int(pltpu.get_tpu_info().vmem_capacity_bytes)
    except Exception:
        return 128 << 20


def _choose_tile_rows(H, W, C, N):
    """Rows of the input image processed per grid step.

    TH is a multiple of 128 // gcd(W, 128) so the flattened tile length TH*W is
    lane-aligned.  Prefer TH that divides H (no pad / output slice), keep the
    (4C, TH*W) f32 slab inside a generation-aware VMEM budget, and keep >= 2
    row tiles when N == 1 (v7x has two TensorCores sharing "parallel" axes).
    """
    step = 128 // math.gcd(W, 128)
    vmem_cap = _vmem_capacity_bytes()
    slab_budget = (2 << 20) if vmem_cap <= (64 << 20) else (4 << 20)
    max_rows = max(step, (slab_budget // (4 * C * W * 4)) // step * step)

    divisors = [t for t in range(step, H + 1, step) if H % t == 0]
    cands = [t for t in divisors if t <= max_rows] or (
        [min(divisors)] if divisors else [])
    if N == 1 and cands:
        two_tile = [t for t in cands if t <= max(step, H // 2)]
        if two_tile:
            cands = two_tile
    if cands:
        return max(cands)
    return min(max_rows, _round_up(H, step))


def _lfsfb_kernel(alpha_ref, x1_ref, x2_ref, x1h_ref, x2h_ref, wfs_ref,
                  wb_ref, y_ref, te_ref):
    """Fused LFSFB tile (channels-first, lane-flattened pixels).

    alpha_ref        : (2,)      SMEM  [alpha1, alpha2]
    x1_ref, x2_ref   : (C, PT)   PT = TH*W flattened pixels of this row tile
    x1h_ref, x2h_ref : (C, W)    first image row of the *next* tile
                                 (zeros past the bottom border)
    wfs_ref          : (C, C)    1x1 conv weight, (Cout, Cin)
    wb_ref           : (4C, 4C)  parity-decomposed deconv block weight
    y_ref            : (4C, PT)  [y_ee; y_eo; y_oe; y_oo] parity planes
    te_ref           : (C, PT+W+1) VMEM scratch holding t plus its halo row
    """
    C, PT = x1_ref.shape
    W = x1h_ref.shape[-1]
    a1 = alpha_ref[0]
    a2 = alpha_ref[1]

    def prelu(v, a):
        return jnp.where(v > 0, v, a * v)

    wfs = wfs_ref[...]

    # ---- stage 1 (stays in VMEM): t = x2 + PReLU(Conv1x1(x1)) -------------
    # Written straight into the scratch ref (main rows + one halo row), so the
    # shifted views below are plain ref loads -- no stitched value copies.
    r = jnp.dot(wfs, x1_ref[...], preferred_element_type=jnp.float32)
    te_ref[:, 0:PT] = x2_ref[...] + prelu(r, a1)
    rh = jnp.dot(wfs, x1h_ref[...], preferred_element_type=jnp.float32)
    te_ref[:, PT:PT + W] = x2h_ref[...] + prelu(rh, a1)
    te_ref[:, PT + W:PT + W + 1] = jnp.zeros((C, 1), jnp.float32)

    # ---- shifted views (zero past the right border) ------------------------
    lane = jax.lax.broadcasted_iota(jnp.int32, (C, PT), 1)
    col_last = (lane % W) == (W - 1)
    zero = jnp.zeros((), jnp.float32)

    t00 = te_ref[:, 0:PT]                                         # t[r,   c  ]
    t01 = jnp.where(col_last, zero, te_ref[:, 1:PT + 1])          # t[r,   c+1]
    t10 = te_ref[:, W:PT + W]                                     # t[r+1, c  ]
    t11 = jnp.where(col_last, zero, te_ref[:, W + 1:PT + W + 1])  # t[r+1, c+1]

    # ---- stage 2: accumulate the four (4C, C) weight column blocks ---------
    wb = wb_ref[...]
    acc = jnp.dot(wb[:, 0:C], t00, preferred_element_type=jnp.float32)
    acc = acc + jnp.dot(wb[:, C:2 * C], t01, preferred_element_type=jnp.float32)
    acc = acc + jnp.dot(wb[:, 2 * C:3 * C], t10,
                        preferred_element_type=jnp.float32)
    acc = acc + jnp.dot(wb[:, 3 * C:4 * C], t11,
                        preferred_element_type=jnp.float32)
    y_ref[...] = prelu(acc, a2)


def lfsfb_forward(x1_nchw, x2_nchw, w_fs, w_ffu, alpha1, alpha2, *, tile_rows=None):
    """Pallas LFSFB forward.
    x1_nchw, x2_nchw : (N, C, H, W) float32
    w_fs  : (C, C, 1, 1)  Conv2d weight          (out, in, kh, kw), bias=False
    w_ffu : (C, C, 3, 3)  ConvTranspose2d weight (in, out, kh, kw), bias=False
    alpha1, alpha2 : scalar PReLU slopes (nn.PReLU() default: one parameter)
    returns (N, C, 2H, 2W) float32
    """
    N, C, H, W = x1_nchw.shape
    step = 128 // math.gcd(W, 128)
    if tile_rows is None:
        TH = _choose_tile_rows(H, W, C, N)
    else:
        TH = min(_round_up(max(int(tile_rows), 1), step), _round_up(H, step))
    Hp = _round_up(H, TH)            # rows padded only if TH does not divide H
    nT = Hp // TH
    PT = TH * W                      # flattened pixels per tile (128-multiple)

    x1 = x1_nchw.astype(jnp.float32)
    x2 = x2_nchw.astype(jnp.float32)

    def prep(x):
        # Main flattened input: NCHW reshape is free (contiguous); only pad
        # when the tile height does not divide H (the default chooser avoids
        # this whenever possible).
        xm = x if Hp == H else jnp.pad(x, ((0, 0), (0, 0), (0, Hp - H), (0, 0)))
        xm = xm.reshape(N, C, Hp * W)
        # Halo rows: first image row of tile i+1 (rows TH, 2TH, ...; zeros
        # beyond the image bottom).  Tiny: nT*C*W elements per batch.
        hro = x[:, :, TH::TH, :]
        k = hro.shape[2]
        if k < nT:
            hro = jnp.pad(hro, ((0, 0), (0, 0), (0, nT - k), (0, 0)))
        else:
            hro = hro[:, :, :nT, :]
        halo = jnp.transpose(hro, (0, 2, 1, 3))          # (N, nT, C, W)
        return xm, halo

    x1m, x1h = prep(x1)
    x2m, x2h = prep(x2)

    # 1x1 conv weight as (Cout, Cin) for the channels-first matmul.
    wfs_mat = w_fs[:, :, 0, 0].astype(jnp.float32)

    # ConvTranspose2d(k=3, s=2, p=1, op=1) split by output parity, packed into
    # one (4C, 4C) block weight (taps_t[k] = W_k^T, k = ky*3 + kx):
    #   y[2r  ,2c  ] = W4 t[r,c]
    #   y[2r  ,2c+1] = W3 t[r,c+1] + W5 t[r,c]
    #   y[2r+1,2c  ] = W1 t[r+1,c] + W7 t[r,c]
    #   y[2r+1,2c+1] = W0 t[r+1,c+1] + W2 t[r+1,c] + W6 t[r,c+1] + W8 t[r,c]
    taps_t = jnp.transpose(w_ffu, (2, 3, 1, 0)).reshape(9, C, C).astype(jnp.float32)
    Z = jnp.zeros((C, C), jnp.float32)
    wb = jnp.concatenate([   # column (view) order: [t00 | t01 | t10 | t11]
        jnp.concatenate([taps_t[4], Z,         Z,         Z        ], axis=1),
        jnp.concatenate([taps_t[5], taps_t[3], Z,         Z        ], axis=1),
        jnp.concatenate([taps_t[7], Z,         taps_t[1], Z        ], axis=1),
        jnp.concatenate([taps_t[8], taps_t[6], taps_t[2], taps_t[0]], axis=1),
    ], axis=0)                                           # (4C, 4C)

    alphas = jnp.asarray([alpha1, alpha2], jnp.float32)
    C4 = 4 * C

    pix_spec = pl.BlockSpec((pl.Squeezed(), C, PT), lambda n, i: (n, 0, i))
    halo_spec = pl.BlockSpec((pl.Squeezed(), pl.Squeezed(), C, W),
                             lambda n, i: (n, i, 0, 0))
    smem_spec = pl.BlockSpec(memory_space=pltpu.MemorySpace.SMEM)

    # VMEM working set estimate (double-buffered pipeline ins/outs + scratch).
    bytes_in = 4 * (2 * C * PT + 2 * C * W + C * C + C4 * C4)
    bytes_out = 4 * C4 * PT
    bytes_scr = 4 * C * (PT + W + 1)
    working_set = 2 * (bytes_in + bytes_out) + bytes_scr
    vmem_cap = _vmem_capacity_bytes()
    vmem_limit = int(min(0.7 * vmem_cap, max(32 << 20, 3 * working_set)))

    cost = pl.CostEstimate(
        flops=2 * N * Hp * W * (C * C + C4 * C4),      # ~34*C^2*H*W*N
        transcendentals=0,
        bytes_accessed=24 * N * C * Hp * W)            # f32 in + out bytes

    y_flat = pl.pallas_call(
        _lfsfb_kernel,
        out_shape=jax.ShapeDtypeStruct((N, C4, Hp * W), jnp.float32),
        grid=(N, nT),
        in_specs=[smem_spec, pix_spec, pix_spec, halo_spec, halo_spec,
                  pl.BlockSpec((C, C), lambda n, i: (0, 0)),
                  pl.BlockSpec((C4, C4), lambda n, i: (0, 0))],
        out_specs=pl.BlockSpec((pl.Squeezed(), C4, PT), lambda n, i: (n, 0, i)),
        scratch_shapes=[pltpu.VMEM((C, PT + W + 1), jnp.float32)],
        compiler_params=pltpu.CompilerParams(
            dimension_semantics=("parallel", "parallel"),
            vmem_limit_bytes=vmem_limit),
        cost_estimate=cost,
    )(alphas, x1m, x2m, x1h, x2h, wfs_mat, wb)

    # TODO(synk): this parity-plane -> NCHW interleave is the one remaining
    # XLA-side pass over the output (no safe Mosaic lane-interleave today).
    y = y_flat.reshape(N, 2, 2, C, Hp, W)
    if Hp != H:
        y = y[:, :, :, :, :H, :]
    y = jnp.transpose(y, (0, 3, 4, 1, 5, 2)).reshape(N, C, 2 * H, 2 * W)
    return y


def lfsfb_reference(x1_nchw, x2_nchw, w_fs, w_ffu, alpha1, alpha2):
    # Pure-JAX reference mirroring the PyTorch module semantics.
    x1 = jnp.transpose(x1_nchw, (0, 2, 3, 1))
    x2 = jnp.transpose(x2_nchw, (0, 2, 3, 1))
    res = jnp.einsum('nhwc,oc->nhwo', x1, w_fs[:, :, 0, 0])
    res = jnp.where(res > 0, res, alpha1 * res)
    t = x2 + res
    k = jnp.flip(w_ffu, axis=(2, 3))                 # (Cin, Cout, 3, 3) flipped
    k_hwio = jnp.transpose(k, (2, 3, 0, 1))          # (kh, kw, Cin, Cout)
    y = jax.lax.conv_general_dilated(
        t, k_hwio, window_strides=(1, 1), padding=((1, 2), (1, 2)),
        lhs_dilation=(2, 2), dimension_numbers=('NHWC', 'HWIO', 'NHWC'))
    y = jnp.where(y > 0, y, alpha2 * y)
    return jnp.transpose(y, (0, 3, 1, 2))


if __name__ == "__main__":
    key = jax.random.PRNGKey(0)
    k1, k2, k3, k4 = jax.random.split(key, 4)
    N, C, H, W = 2, 4, 16, 16

    x1 = jax.random.normal(k1, (N, C, H, W), jnp.float32)
    x2 = jax.random.normal(k2, (N, C, H, W), jnp.float32)
    # Deterministic synthetic parameters (module shapes from __init__; both
    # convolutions are constructed with bias=False in the PyTorch module):
    w_fs = jax.random.normal(k3, (C, C, 1, 1), jnp.float32) * 0.2   # FS: Conv2d 1x1
    w_ffu = jax.random.normal(k4, (C, C, 3, 3), jnp.float32) * 0.2  # FFU: ConvT 3x3 s2
    alpha1 = 0.25   # nn.PReLU() default init
    alpha2 = 0.25

    ref = lfsfb_reference(x1, x2, w_fs, w_ffu, alpha1, alpha2)

    # Default tiling (single row tile at this small size).
    out = jax.block_until_ready(lfsfb_forward(x1, x2, w_fs, w_ffu, alpha1, alpha2))
    np.testing.assert_allclose(np.asarray(out), np.asarray(ref), rtol=1e-4, atol=1e-4)
    assert out.shape == (N, C, 2 * H, 2 * W)

    # Also exercise the multi-tile / halo path explicitly.
    out_tiled = jax.block_until_ready(
        lfsfb_forward(x1, x2, w_fs, w_ffu, alpha1, alpha2, tile_rows=8))
    np.testing.assert_allclose(np.asarray(out_tiled), np.asarray(ref), rtol=1e-4, atol=1e-4)

    print("KERNEL_OK")
</pallas_src>

<mosaic_0001>
module attributes {stable_mosaic.version = 11 : i64} {
  func.func @_lfsfb_kernel(%arg0: i32, %arg1: i32, %arg2: memref<2xf32, #tpu.memory_space<smem>>, %arg3: memref<1x4x256xf32, #tpu.memory_space<vmem>>, %arg4: memref<1x4x256xf32, #tpu.memory_space<vmem>>, %arg5: memref<1x1x4x16xf32, #tpu.memory_space<vmem>>, %arg6: memref<1x1x4x16xf32, #tpu.memory_space<vmem>>, %arg7: memref<4x4xf32, #tpu.memory_space<vmem>>, %arg8: memref<16x16xf32, #tpu.memory_space<vmem>>, %arg9: memref<1x16x256xf32, #tpu.memory_space<vmem>>, %arg10: memref<4x273xf32, #tpu.memory_space<vmem>>) attributes {dimension_semantics = [#tpu.dimension_semantics<parallel>, #tpu.dimension_semantics<parallel>], iteration_bounds = array<i64: 2, 1>, scalar_prefetch = 0 : i64, scratch_operands = 1 : i64, tpu.core_type = #tpu.core_type<tc>, window_params = [{transform_indices = @transform_0, window_bounds = array<i64: 2>}, {transform_indices = @transform_1, window_bounds = array<i64: 1, 4, 256>}, {transform_indices = @transform_2, window_bounds = array<i64: 1, 4, 256>}, {transform_indices = @transform_3, window_bounds = array<i64: 1, 1, 4, 16>}, {transform_indices = @transform_4, window_bounds = array<i64: 1, 1, 4, 16>}, {pipeline_mode = #tpu.pipeline_mode<synchronous>, transform_indices = @transform_5, window_bounds = array<i64: 4, 4>}, {pipeline_mode = #tpu.pipeline_mode<synchronous>, transform_indices = @transform_6, window_bounds = array<i64: 16, 16>}, {transform_indices = @transform_7, window_bounds = array<i64: 1, 16, 256>}]} {
    %c0 = arith.constant 0 : index
    %0 = memref.load %arg2[%c0] : memref<2xf32, #tpu.memory_space<smem>>
    %c1 = arith.constant 1 : index
    %1 = memref.load %arg2[%c1] : memref<2xf32, #tpu.memory_space<smem>>
    %c0_0 = arith.constant 0 : index
    %c0_1 = arith.constant 0 : index
    %2 = vector.load %arg7[%c0_0, %c0_1] : memref<4x4xf32, #tpu.memory_space<vmem>>, vector<4x4xf32>
    %c0_2 = arith.constant 0 : index
    %c0_3 = arith.constant 0 : index
    %c0_4 = arith.constant 0 : index
    %3 = vector.load %arg3[%c0_2, %c0_3, %c0_4] : memref<1x4x256xf32, #tpu.memory_space<vmem>>, vector<1x4x256xf32>
    %4 = vector.shape_cast %3 : vector<1x4x256xf32> to vector<4x256xf32>
    %cst = arith.constant dense<0.000000e+00> : vector<4x256xf32>
    %5 = tpu.matmul %2, %4, %cst {dimension_numbers = #tpu.dot_dimension_numbers<[1], [0], [0], [1], [0, 0, 1, 1], [], []>} : vector<4x4xf32>, vector<4x256xf32>, vector<4x256xf32> -> vector<4x256xf32>
    %c0_5 = arith.constant 0 : index
    %c0_6 = arith.constant 0 : index
    %c0_7 = arith.constant 0 : index
    %6 = vector.load %arg4[%c0_5, %c0_6, %c0_7] : memref<1x4x256xf32, #tpu.memory_space<vmem>>, vector<1x4x256xf32>
    %7 = vector.shape_cast %6 : vector<1x4x256xf32> to vector<4x256xf32>
    %cst_8 = arith.constant 0.000000e+00 : f32
    %8 = vector.broadcast %cst_8 : f32 to vector<4x256xf32>
    %9 = arith.cmpf ogt, %5, %8 : vector<4x256xf32>
    %10 = vector.broadcast %0 : f32 to vector<4x256xf32>
    %11 = arith.mulf %10, %5 : vector<4x256xf32>
    %12 = arith.select %9, %5, %11 : vector<4x256xi1>, vector<4x256xf32>
    %13 = arith.addf %7, %12 : vector<4x256xf32>
    %c0_9 = arith.constant 0 : index
    %c0_10 = arith.constant 0 : index
    %14 = vector.load %arg10[%c0_9, %c0_10] : memref<4x273xf32, #tpu.memory_space<vmem>>, vector<4x256xf32>
    tpu.vector_store %arg10[%c0_9, %c0_10], %13 {strides = array<i32>} : memref<4x273xf32, #tpu.memory_space<vmem>>, vector<4x256xf32>,
    %c0_11 = arith.constant 0 : index
    %c0_12 = arith.constant 0 : index
    %c0_13 = arith.constant 0 : index
    %c0_14 = arith.constant 0 : index
    %15 = vector.load %arg5[%c0_11, %c0_12, %c0_13, %c0_14] : memref<1x1x4x16xf32, #tpu.memory_space<vmem>>, vector<1x1x4x16xf32>
    %16 = vector.shape_cast %15 : vector<1x1x4x16xf32> to vector<4x16xf32>
    %cst_15 = arith.constant dense<0.000000e+00> : vector<4x16xf32>
    %17 = tpu.matmul %2, %16, %cst_15 {dimension_numbers = #tpu.dot_dimension_numbers<[1], [0], [0], [1], [0, 0, 1, 1], [], []>} : vector<4x4xf32>, vector<4x16xf32>, vector<4x16xf32> -> vector<4x16xf32>
    %c0_16 = arith.constant 0 : index
    %c0_17 = arith.constant 0 : index
    %c0_18 = arith.constant 0 : index
    %c0_19 = arith.constant 0 : index
    %18 = vector.load %arg6[%c0_16, %c0_17, %c0_18, %c0_19] : memref<1x1x4x16xf32, #tpu.memory_space<vmem>>, vector<1x1x4x16xf32>
    %19 = vector.shape_cast %18 : vector<1x1x4x16xf32> to vector<4x16xf32>
    %cst_20 = arith.constant 0.000000e+00 : f32
    %20 = vector.broadcast %cst_20 : f32 to vector<4x16xf32>
    %21 = arith.cmpf ogt, %17, %20 : vector<4x16xf32>
    %22 = vector.broadcast %0 : f32 to vector<4x16xf32>
    %23 = arith.mulf %22, %17 : vector<4x16xf32>
    %24 = arith.select %21, %17, %23 : vector<4x16xi1>, vector<4x16xf32>
    %25 = arith.addf %19, %24 : vector<4x16xf32>
    %c0_21 = arith.constant 0 : index
    %c256 = arith.constant 256 : index
    %26 = vector.load %arg10[%c0_21, %c256] : memref<4x273xf32, #tpu.memory_space<vmem>>, vector<4x16xf32>
    tpu.vector_store %arg10[%c0_21, %c256], %25 {strides = array<i32>} : memref<4x273xf32, #tpu.memory_space<vmem>>, vector<4x16xf32>,
    %cst_22 = arith.constant 0.000000e+00 : f32
    %27 = vector.broadcast %cst_22 : f32 to vector<4x1xf32>
    %c0_23 = arith.constant 0 : index
    %c272 = arith.constant 272 : index
    %28 = vector.load %arg10[%c0_23, %c272] : memref<4x273xf32, #tpu.memory_space<vmem>>, vector<4x1xf32>
    tpu.vector_store %arg10[%c0_23, %c272], %27 {strides = array<i32>} : memref<4x273xf32, #tpu.memory_space<vmem>>, vector<4x1xf32>,
    %29 = tpu.iota {dimensions = array<i32: 1>} : vector<4x256xi32>
    %c16_i32 = arith.constant 16 : i32
    %c0_i32 = arith.constant 0 : i32
    %30 = arith.cmpi eq, %c16_i32, %c0_i32 : i32
    %c1_i32 = arith.constant 1 : i32
    %31 = arith.select %30, %c1_i32, %c16_i32 : i32
    %32 = vector.broadcast %31 : i32 to vector<4x256xi32>
    %33 = arith.remsi %29, %32 : vector<4x256xi32>
    %c0_i32_24 = arith.constant 0 : i32
    %34 = vector.broadcast %c0_i32_24 : i32 to vector<4x256xi32>
    %35 = arith.cmpi ne, %33, %34 : vector<4x256xi32>
    %c0_i32_25 = arith.constant 0 : i32
    %36 = vector.broadcast %c0_i32_25 : i32 to vector<4x256xi32>
    %37 = arith.cmpi slt, %33, %36 : vector<4x256xi32>
    %c0_i32_26 = arith.constant 0 : i32
    %38 = arith.cmpi slt, %31, %c0_i32_26 : i32
    %39 = vector.broadcast %38 : i1 to vector<4x256xi1>
    %40 = vector.broadcast %39 : vector<4x256xi1> to vector<4x256xi1>
    %41 = arith.xori %37, %40 : vector<4x256xi1>
    %42 = arith.andi %41, %35 : vector<4x256xi1>
    %43 = vector.broadcast %31 : i32 to vector<4x256xi32>
    %44 = arith.addi %33, %43 : vector<4x256xi32>
    %45 = arith.select %42, %44, %33 : vector<4x256xi1>, vector<4x256xi32>
    %c15_i32 = arith.constant 15 : i32
    %46 = vector.broadcast %c15_i32 : i32 to vector<4x256xi32>
    %47 = arith.cmpi eq, %45, %46 : vector<4x256xi32>
    %c0_27 = arith.constant 0 : index
    %c0_28 = arith.constant 0 : index
    %48 = vector.load %arg10[%c0_27, %c0_28] : memref<4x273xf32, #tpu.memory_space<vmem>>, vector<4x256xf32>
    %c0_29 = arith.constant 0 : index
    %c1_30 = arith.constant 1 : index
    %49 = vector.load %arg10[%c0_29, %c1_30] : memref<4x273xf32, #tpu.memory_space<vmem>>, vector<4x256xf32>
    %cst_31 = arith.constant 0.000000e+00 : f32
    %50 = vector.broadcast %cst_31 : f32 to vector<4x256xf32>
    %51 = arith.select %47, %50, %49 : vector<4x256xi1>, vector<4x256xf32>
    %c0_32 = arith.constant 0 : index
    %c16 = arith.constant 16 : index
    %52 = vector.load %arg10[%c0_32, %c16] : memref<4x273xf32, #tpu.memory_space<vmem>>, vector<4x256xf32>
    %c0_33 = arith.constant 0 : index
    %c17 = arith.constant 17 : index
    %53 = vector.load %arg10[%c0_33, %c17] : memref<4x273xf32, #tpu.memory_space<vmem>>, vector<4x256xf32>
    %cst_34 = arith.constant 0.000000e+00 : f32
    %54 = vector.broadcast %cst_34 : f32 to vector<4x256xf32>
    %55 = arith.select %47, %54, %53 : vector<4x256xi1>, vector<4x256xf32>
    %c0_35 = arith.constant 0 : index
    %c0_36 = arith.constant 0 : index
    %56 = vector.load %arg8[%c0_35, %c0_36] : memref<16x16xf32, #tpu.memory_space<vmem>>, vector<16x16xf32>
    %57 = vector.extract_strided_slice %56 {offsets = [0, 0], sizes = [16, 4], strides = [1, 1]} : vector<16x16xf32> to vector<16x4xf32>
    %cst_37 = arith.constant dense<0.000000e+00> : vector<16x256xf32>
    %58 = tpu.matmul %57, %48, %cst_37 {dimension_numbers = #tpu.dot_dimension_numbers<[1], [0], [0], [1], [0, 0, 1, 1], [], []>} : vector<16x4xf32>, vector<4x256xf32>, vector<16x256xf32> -> vector<16x256xf32>
    %59 = vector.extract_strided_slice %56 {offsets = [0, 4], sizes = [16, 4], strides = [1, 1]} : vector<16x16xf32> to vector<16x4xf32>
    %cst_38 = arith.constant dense<0.000000e+00> : vector<16x256xf32>
    %60 = tpu.matmul %59, %51, %cst_38 {dimension_numbers = #tpu.dot_dimension_numbers<[1], [0], [0], [1], [0, 0, 1, 1], [], []>} : vector<16x4xf32>, vector<4x256xf32>, vector<16x256xf32> -> vector<16x256xf32>
    %61 = arith.addf %58, %60 : vector<16x256xf32>
    %62 = vector.extract_strided_slice %56 {offsets = [0, 8], sizes = [16, 4], strides = [1, 1]} : vector<16x16xf32> to vector<16x4xf32>
    %cst_39 = arith.constant dense<0.000000e+00> : vector<16x256xf32>
    %63 = tpu.matmul %62, %52, %cst_39 {dimension_numbers = #tpu.dot_dimension_numbers<[1], [0], [0], [1], [0, 0, 1, 1], [], []>} : vector<16x4xf32>, vector<4x256xf32>, vector<16x256xf32> -> vector<16x256xf32>
    %64 = arith.addf %61, %63 : vector<16x256xf32>
    %65 = vector.extract_strided_slice %56 {offsets = [0, 12], sizes = [16, 4], strides = [1, 1]} : vector<16x16xf32> to vector<16x4xf32>
    %cst_40 = arith.constant dense<0.000000e+00> : vector<16x256xf32>
    %66 = tpu.matmul %65, %55, %cst_40 {dimension_numbers = #tpu.dot_dimension_numbers<[1], [0], [0], [1], [0, 0, 1, 1], [], []>} : vector<16x4xf32>, vector<4x256xf32>, vector<16x256xf32> -> vector<16x256xf32>
    %67 = arith.addf %64, %66 : vector<16x256xf32>
    %cst_41 = arith.constant 0.000000e+00 : f32
    %68 = vector.broadcast %cst_41 : f32 to vector<16x256xf32>
    %69 = arith.cmpf ogt, %67, %68 : vector<16x256xf32>
    %70 = vector.broadcast %1 : f32 to vector<16x256xf32>
    %71 = arith.mulf %70, %67 : vector<16x256xf32>
    %72 = arith.select %69, %67, %71 : vector<16x256xi1>, vector<16x256xf32>
    %c0_42 = arith.constant 0 : index
    %c0_43 = arith.constant 0 : index
    %c0_44 = arith.constant 0 : index
    %73 = vector.load %arg9[%c0_42, %c0_43, %c0_44] : memref<1x16x256xf32, #tpu.memory_space<vmem>>, vector<1x16x256xf32>
    %74 = vector.shape_cast %73 : vector<1x16x256xf32> to vector<16x256xf32>
    %75 = vector.shape_cast %72 : vector<16x256xf32> to vector<1x16x256xf32>
    tpu.vector_store %arg9[%c0_42, %c0_43, %c0_44], %75 {strides = array<i32>} : memref<1x16x256xf32, #tpu.memory_space<vmem>>, vector<1x16x256xf32>,
    return
  }
  func.func @transform_0(%arg0: i32, %arg1: i32) -> i32 {
    %c0_i32 = arith.constant 0 : i32
    %c0_i32_0 = arith.constant 0 : i32
    return %c0_i32 : i32
  }
  func.func @transform_1(%arg0: i32, %arg1: i32) -> (i32, i32, i32) {
    %c0_i32 = arith.constant 0 : i32
    %c0_i32_0 = arith.constant 0 : i32
    return %arg0, %c0_i32, %arg1 : i32, i32, i32
  }
  func.func @transform_2(%arg0: i32, %arg1: i32) -> (i32, i32, i32) {
    %c0_i32 = arith.constant 0 : i32
    %c0_i32_0 = arith.constant 0 : i32
    return %arg0, %c0_i32, %arg1 : i32, i32, i32
  }
  func.func @transform_3(%arg0: i32, %arg1: i32) -> (i32, i32, i32, i32) {
    %c0_i32 = arith.constant 0 : i32
    %c0_i32_0 = arith.constant 0 : i32
    %c0_i32_1 = arith.constant 0 : i32
    return %arg0, %arg1, %c0_i32, %c0_i32_0 : i32, i32, i32, i32
  }
  func.func @transform_4(%arg0: i32, %arg1: i32) -> (i32, i32, i32, i32) {
    %c0_i32 = arith.constant 0 : i32
    %c0_i32_0 = arith.constant 0 : i32
    %c0_i32_1 = arith.constant 0 : i32
    return %arg0, %arg1, %c0_i32, %c0_i32_0 : i32, i32, i32, i32
  }
  func.func @transform_5(%arg0: i32, %arg1: i32) -> (i32, i32) {
    %c0_i32 = arith.constant 0 : i32
    %c0_i32_0 = arith.constant 0 : i32
    %c0_i32_1 = arith.constant 0 : i32
    return %c0_i32, %c0_i32_0 : i32, i32
  }
  func.func @transform_6(%arg0: i32, %arg1: i32) -> (i32, i32) {
    %c0_i32 = arith.constant 0 : i32
    %c0_i32_0 = arith.constant 0 : i32
    %c0_i32_1 = arith.constant 0 : i32
    return %c0_i32, %c0_i32_0 : i32, i32
  }
  func.func @transform_7(%arg0: i32, %arg1: i32) -> (i32, i32, i32) {
    %c0_i32 = arith.constant 0 : i32
    %c0_i32_0 = arith.constant 0 : i32
    return %arg0, %c0_i32, %arg1 : i32, i32, i32
  }
}

</mosaic_0001>

<bundles_post_ra>
// kernel: tpu_custom_call.1
= control target key start
LH: loop header
LB: loop body
LE: loop exit
PB: predicated region body
PF: predicated region fallthrough
CT: control target
= control target key end

     0   :  { %s1878_s0 = inlined_call_operand.hbm [shape: f32[2], index: 0, kind: input, shape index: {}]   ;;  %s1879_s1 = inlined_call_operand.hbm [shape: f32[2,4,256], index: 1, kind: input, shape index: {}]   ;;  %s1880_s2 = inlined_call_operand.hbm [shape: f32[2,4,256], index: 2, kind: input, shape index: {}]   ;;  %s1881_s3 = inlined_call_operand.hbm [shape: f32[2,1,4,16], index: 3, kind: input, shape index: {}]   ;;  %s1882_s4 = inlined_call_operand.hbm [shape: f32[2,1,4,16], index: 4, kind: input, shape index: {}]   ;;  %s1883_s5 = inlined_call_operand.vmem [shape: f32[4,4], index: 5, kind: input, shape index: {}]   ;;  %s1884_s6 = inlined_call_operand.hbm [shape: f32[16,16], index: 6, kind: input, shape index: {}]   ;;  %s1885_s7 = inlined_call_operand.hbm [shape: f32[2,16,256], index: 7, kind: output, shape index: {}]  }
   0x1   :  { %1894 = sst [smem:[#allocation27_spill]] %s1880_s2 }
   0x2   :  { %1895 = sst [smem:[#allocation28_spill]] %s1884_s6 }
   0x3   :  { %1896 = sst [smem:[#allocation29_spill]] %s1885_s7 }
   0x4   :  { %12 = vsyncpa [#allocation6], 0 }
   0x5   :  { %13 = vsyncpa [#allocation4], 0 }
   0x6   :  { %15 = vsyncpa [#allocation4 + $0x1], 0 }
   0x7   :  { %16 = vsyncpa [#allocation9], 0 }
   0x8   :  { %18 = vsyncpa [#allocation9 + $0x1], 0 }
   0x9   :  { %19 = vsyncpa [#allocation12], 0 }
   0xa   :  { %21 = vsyncpa [#allocation12 + $0x1], 0 }
   0xb   :  { %22 = vsyncpa [#allocation5], 0 }
   0xc   :  { %24 = vsyncpa [#allocation5 + $0x1], 0  ;;  %s1619_s24 = smov 0   ;;  %s1621_s25 = smov 0  }
   0xd   :  { %s1623_s26 = smov 0   ;;  %s1625_s27 = smov 0  }
   0xe   :  { %s1627_s28 = smov 0   ;;  %s1629_s29 = smov 0  }
   0xf LB: > { %1897 = sst [smem:[#allocation21_spill]] %s1544_s24  ;;  %s1650_s30 = sadd.s32 4294967295, %s1564_s29   ;;  %s1564_s29 = sphi %s1629_s29, %s30_s29   ;;  %s1560_s28 = sphi %s1627_s28, %s1926_s28   ;;  %s1556_s27 = sphi %s1625_s27, %s1925_s27   ;;  %s1552_s26 = sphi %s1623_s26, %s1921_s26   ;;  %s1548_s25 = sphi %s1621_s25, %s1924_s25   ;;  %s1544_s24 = sphi %s1619_s24, %s1923_s24  }
  0x10   : > { %1898 = sst [smem:[#allocation22_spill]] %s1552_s26  ;;  %s1130_s8 = sadd.s32 4294967294, %s1564_s29  }
  0x11   : > { %p85_p0 = scmp.ne.s32.totalorder %s1548_s25, %s1544_s24  ;;  %p86_p1 = scmp.eq.s32.totalorder %s1650_s30, 0 }
  0x12   : > { %p237_p2 = scmp.eq.s32.totalorder %s1650_s30, 1  ;;  %p243_p3 = scmp.eq.s32.totalorder %s1130_s8, 1 }
  0x13   : > { %p1659_p4 = por %p86_p1, %p85_p0  ;;  %p1131_p5 = scmp.ge.s32.totalorder %s1564_s29, 1 }
  0x14   : > { %p1664_p6 = por %p243_p3, %p85_p0  ;;  %p250_p7 = scmp.lt.s32.totalorder %s1564_s29, 3 }
  0x15   : > { %s1902_s6 = sld [smem:[#allocation28_spill]]  ;;  %s1566_s15 = smov [#allocation13]  }
  0x16   : > { %s1900_s10 = scalar_select %p1664_p6, 1, 0 }
  0x17   : > { %p1672_p8 = pnand %p1131_p5, %p250_p7  ;;  %s276_s16 = sshll.u32 %s1566_s15, 4  ;;  %s277_s16 = int_to_ptr.vmem [resolvable:$true] %s276_s16 }
  0x18   : > { %1901 = sst [smem:[#allocation23_spill]] %s1900_s10  ;;  %p1134_p11 = scmp.ge.s32.totalorder %s1564_s29, 2 }
  0x19   : > { %p1210_p9 = pneg %p1672_p8  ;;  %s1567_s18 = smov 128  }
  0x1a   : > { %s1568_s19 = smov 8   ;;  %s42_s20 = sadd.s32 1, %s1560_s28 }
  0x1b   : > { %s274_s13 = sshll.u32 %s1902_s6, 4  ;;  %p1680_p10 = pnand %p1210_p9, %p86_p1  ;;  %s275_s13 = int_to_ptr.hbm [resolvable:$true] %s274_s13 }
  0x1c   : > { %p44_p12 = scmp.ge.s32.totalorder %s42_s20, 2  ;;  %s72_s21 = sadd.s32 1, %s1552_s26 }
  0x1d   : > { %1216 = dma.hbm_to_vmem [thread:$0]  (!%p1680_p10), %s275_s13, 256, %s277_s16, [#allocation12], %s1567_s18, %s1567_s18, %s1568_s19  }
  0x1e   : > { %p79_p13 = scmp.ne.s32.totalorder %s1552_s26, %s1548_s25  ;;  %p80_p0 = scmp.eq.s32.totalorder %s1564_s29, 0 }
  0x1f   : > { %s1928_s20 = smov (%p44_p12, %s42_s20), 0  ;;  %p1236_p7 = scmp.lt.s32.totalorder %s1564_s29, 2 }
  0x20   : > { %1905 = sst [smem:[#allocation24_spill]] %s1928_s20  ;;  %p81_p3 = por %p80_p0, %p79_p13 }
  0x21   : > { %p1696_p5 = por %p237_p2, %p79_p13  ;;  %s67_s23 = ssub.s32 %s1560_s28, %s1928_s20 }
  0x22   : > { %p70_p9 = scmp.eq.s32.totalorder %s67_s23, 0  ;;  %s1704_s8 = sand.u32 1, %s1552_s26  }
  0x23   : > { %s1906_s22 = scalar_select %p1696_p5, 1, 0 }
  0x24   : > { %s1135_s11 = sshll.u32 %s1704_s8, 3  ;;  %s1189_s12 = sshll.u32 %s1560_s28, 3 }
  0x25   : > { %1907 = sst [smem:[#allocation25_spill]] %s1906_s22  ;;  %p1711_p12 = pnand %p1236_p7, %p81_p3 }
  0x26   : > { %s1709_s13 = scalar_select %p70_p9, %s1552_s26, %s72_s21  }
  0x27   : > { %s1893_s16 = sand.u32 1, %s1564_s29   ;;  %s1910_s2 = sld [smem:[#allocation27_spill]] }
  0x28   : > { %1908 = sst [smem:[#allocation26_spill]] %s1709_s13  ;;  %s316_s23 = scalar_lea.vmem [#allocation8], %s1135_s11 }
  0x29   : > { %s327_s10 = sshll.u32 %s316_s23, 4  ;;  %s313_s21 = scalar_lea.sflag [#allocation9], %s1893_s16  ;;  %s328_s10 = int_to_ptr.vmem [resolvable:$true] %s327_s10 }
  0x2a   : > { %s262_s24 = sshll.u32 %s1878_s0, 4  ;;  %s1569_s18 = smov [#allocation3]   ;;  %s263_s24 = int_to_ptr.hbm [resolvable:$true] %s262_s24 }
  0x2b   : > { %1213 = dma.hbm_to_smem (!%p1680_p10), %s263_s24, 16, %s1569_s18, [#allocation6]  }
  0x2c   : > { %s301_s23 = scalar_lea.hbm %s1879_s1, %s1189_s12  ;;  %s1141_s16 = sshll.u32 %s1704_s8, 2 }
  0x2d   : > { %s323_s6 = scalar_lea.hbm %s1910_s2, %s1189_s12  ;;  %s294_s2 = scalar_lea.vmem [#allocation7], %s1135_s11 }
  0x2e   : > { %s325_s20 = sshll.u32 %s323_s6, 4  ;;  %s305_s22 = sshll.u32 %s294_s2, 4  ;;  %s326_s20 = int_to_ptr.hbm [resolvable:$true] %s325_s20  ;;  %s306_s22 = int_to_ptr.vmem [resolvable:$true] %s305_s22 }
  0x2f   : > { %1223 = dma.hbm_to_vmem [thread:$0]  (!%p1711_p12), %s326_s20, 128, %s328_s10, %s313_s21  }
  0x30   : > { %s303_s7 = sshll.u32 %s301_s23, 4  ;;  %s291_s10 = scalar_lea.sflag [#allocation4], %s1704_s8  ;;  %s304_s7 = int_to_ptr.hbm [resolvable:$true] %s303_s7 }
  0x31   : > { %1220 = dma.hbm_to_vmem [thread:$0]  (!%p1711_p12), %s304_s7, 128, %s306_s22, %s291_s10  }
  0x32   : > { %s1142_s26 = sshll.u32 %s1560_s28, 2  ;;  %s338_s13 = scalar_lea.vmem [#allocation10], %s1141_s16 }
  0x33   : > { %s343_s24 = scalar_lea.hbm %s1881_s3, %s1142_s26  ;;  %s347_s18 = sshll.u32 %s338_s13, 4  ;;  %s348_s18 = int_to_ptr.vmem [resolvable:$true] %s347_s18 }
  0x34   : > { %s345_s12 = sshll.u32 %s343_s24, 4  ;;  %s363_s8 = scalar_lea.hbm %s1882_s4, %s1142_s26  ;;  %s346_s12 = int_to_ptr.hbm [resolvable:$true] %s345_s12 }
  0x35   : > { %1226 = dma.hbm_to_vmem [thread:$0]  (!%p1711_p12), %s346_s12, 64, %s348_s18, %s313_s21  }
  0x36   : > { %s358_s6 = scalar_lea.vmem [#allocation11], %s1141_s16  ;;  %s365_s7 = sshll.u32 %s363_s8, 4  ;;  %s366_s7 = int_to_ptr.hbm [resolvable:$true] %s365_s7 }
  0x37   : > { %s367_s19 = sshll.u32 %s358_s6, 4  ;;  %s1911_s22 = sand.u32 1, %s1564_s29   ;;  %s368_s19 = int_to_ptr.vmem [resolvable:$true] %s367_s19 }
  0x38   : > { %s355_s23 = scalar_lea.sflag [#allocation12], %s1911_s22  ;;  %376 = sbr.rel (%p1672_p8) target bundleno = 524 (0x20c), region = 48 }
  0x39   : > { %1229 = dma.hbm_to_vmem [thread:$0]  (!%p1711_p12), %s366_s7, 64, %s368_s19, %s355_s23  }
  0x3d   : > { %1519 = dma.done.wait (%p86_p1), [#allocation6], 16  }
  0x3e   : > { %1521 = vsyncadd (%p86_p1), [#allocation6], 4294967280  ;;  %s1755_s16 = sand.u32 1, %s1548_s25  }
  0x3f   : > { %s1147_s21 = sshll.u32 %s1755_s16, 3  ;;  %s384_s10 = scalar_lea.sflag [#allocation4], %s1755_s16 }
  0x40   : > { %s387_s26 = scalar_lea.vmem [#allocation7], %s1147_s21 }
  0x41   : > { %1523 = dma.done.wait (%p1659_p4), %s384_s10, 128  }
  0x42   : > { %1525 = vsyncadd (%p1659_p4), %s384_s10, 4294967168  ;;  %s393_s14 = sand.u32 1, %s1650_s30   ;;  %s1764_s20 = scalar_lea.vmem [#allocation8], %s1147_s21 }
  0x43   : > { %s394_s15 = scalar_lea.sflag [#allocation9], %s393_s14 }
  0x44   : > { %1527 = dma.done.wait (%p1659_p4), %s394_s15, 192  }
  0x45   : > { %1529 = vsyncadd (%p1659_p4), %s394_s15, 4294967104  ;;  %s1149_s17 = sshll.u32 %s1755_s16, 2  ;;  %s414_s13 = scalar_lea.sflag [#allocation12], %s393_s14 }
  0x46   : > { %s407_s24 = scalar_lea.vmem [#allocation10], %s1149_s17  ;;  %s417_s18 = scalar_lea.vmem [#allocation11], %s1149_s17 }
  0x47   : > { %1531 = dma.done.wait (%p1659_p4), %s414_s13, 64  }
  0x48   : > { %1533 = vsyncadd (%p1659_p4), %s414_s13, 4294967232 }
  0x49   : > { %1535 = dma.done.wait (%p86_p1), [#allocation12], 256  }
  0x4a   : > { %1537 = vsyncadd (%p86_p1), [#allocation12], 4294967040 }
  0x4b   : > { %428 = sfence }
  0x4c   : > { %vm485_vm0 = vcmask 1043456   ;;  %v545_v0 = vld [vmem:[%s407_s24] sm:$0xf]  ;;  %vm481_vm1 = vcmask 31744   ;;  %v653_v5 = vld [vmem:[#allocation13] sm:$0xff]  ;;  %s1570_s30 = smov 124   ;;  %v578_v38 = vlaneseq }
  0x4d   : > { %v475_v1 = vld [vmem:[%s1883_s5] sm:$0xf]  ;;  %1158 = vmatpush.msk.msra.mxu2 %vm485_vm0, %v545_v0  ;;  %657 = vrot.lane.b32.xlu1 %v653_v5, %s1570_s30  ;;  %s473_s9 = sld [smem:[#allocation3]]  ;;  %v1788_v6 = vld [vmem:[#allocation13 + $0x8] sm:$0xff]  ;;  %v569_v10 = vld [vmem:[%s417_s18] sm:$0xf] }
  0x4e   : > { %v476_v2 = vld [vmem:[%s387_s26] sm:$0xff]  ;;  %1159 = vmatmul.msk.f32.vlgmr.msra.gmra.mxu2 %vm481_vm1, %v475_v1  ;;  %659 = vrot.lane.b32.xlu2 %v1788_v6, %s1570_s30  ;;  %vm574_vm4 = vcmask 125952   ;;  %vm576_vm6 = vcmask 134272   ;;  %v530_v18 = vld [vmem:[%s1764_s20] sm:$0xff]  ;;  %v1571_v21 = vmov 0.0   ;;  %s1572_s11 = smov 127  }
  0x4f   : > { %478 = vst [vmem:[#allocation1] ss:$2 sm:$0xff] %v476_v2  ;;  %s1573_s8 = smov 111   ;;  %s1574_s6 = smov 120   ;;  %v579_v40 = vand.u32 127, %v578_v38  ;;  %vm623_vm7 = vcmask 1039360  }
  0x50   : > { %s1575_s19 = smov 116   ;;  %s1576_s7 = smov 112   ;;  %vm646_vm10 = vcmask 908288   ;;  %vm790_vm11 = vcmask 916480  }
  0x51   : > { %v580_v42 = vadd.s32 128, %v579_v40  ;;  %v585_v46 = vand.u32 15, %v579_v40  ;;  %s1153_s22 = sld [smem:[#allocation3 + $0x1]]  ;;  %s1152_s23 = sshll.u32 %s1755_s16, 5 }
  0x52   : > { %s469_s21 = scalar_lea.vmem [#allocation14], %s1152_s23  ;;  %s1191_s10 = sshll.u32 %s1556_s27, 5 }
  0x53   : > { %v533_v7 = vstv %s473_s9  ;;  %v592_v45 = vand.u32 15, %v580_v42  ;;  %vm1807_vm9 = vcmp.eq.s32.totalorder %v585_v46, 15  ;;  %s1916_s15 = sld [smem:[#allocation29_spill]]  ;;  %s947_s17 = sshll.u32 %s469_s21, 4  ;;  %s948_s17 = int_to_ptr.vmem [resolvable:$true] %s947_s17 }
  0x54   : > { %s933_s13 = scalar_lea.sflag [#allocation5], %s1755_s16 }
  0x55   : > { %vm1803_vm8 = vcmp.eq.s32.totalorder %v592_v45, 15 }
  0x56   : > { %v479_v3 = vld.sshfl [vmem:[#allocation1] sm:$0xff pattern:$0x75316420]  ;;  %v480_v4 = vld.sshfl [vmem:[#allocation1 + $0x8] sm:$0xff pattern:$0x75316420] }
  0x57   : > { %1154 = vmatpush.msk.msra.mxu0 %vm485_vm0, %v479_v3  ;;  %1156 = vmatpush.msk.msra.mxu1 %vm485_vm0, %v480_v4 }
  0x58   : > { %1155 = vmatmul.msk.f32.vlgmr.msra.gmra.mxu0 %vm481_vm1, %v475_v1  ;;  %1157 = vmatmul.msk.f32.vlgmr.msra.gmra.mxu1 %vm481_vm1, %v475_v1 }
  0x59   : > { %s946_s20 = scalar_lea.hbm %s1916_s15, %s1191_s10  ;;  %s1486_s9 = scalar_lea.hbm %s1916_s15, 64 }
  0x5a   : > { %s949_s27 = sshll.u32 %s946_s20, 4  ;;  %s950_s27 = int_to_ptr.hbm [resolvable:$true] %s949_s27 }
  0x5b   : > { %s1480_s18 = sshra.s32 %s950_s27, 4  ;;  %s1481_s18 = int_to_ptr.hbm [resolvable:$true] %s1480_s18 }
  0x5c   : > { %s1482_s12 = scalar_lea.hbm %s1481_s18, 32  ;;  %p1487_p8 = scmp.lt.s32.totalorder %s1481_s18, %s1916_s15 }
  0x5d   : > { %p1483_p1 = scmp.ne.s32.totalorder %s1481_s18, %s1482_s12  ;;  %p1488_p10 = scmp.lt.s32.totalorder %s1486_s9, %s1482_s12 }
  0x5f   : > { %p1484_p2 = pnand %p1483_p1, %p1696_p5  ;;  %p1489_p13 = por %p1488_p10, %p1487_p8 }
  0x61   : > { %p1485_p4 = pneg %p1484_p2 }
  0x63   : > { %p1490_p0 = pnand %p1489_p13, %p1485_p4 }
  0xa8   : > { %v660_v37 = vpop.permute.xlu2 %659 }
  0xbf   : > { %v658_v39 = vpop.permute.xlu1 %657 }
  0xd1   : > { %v566_v8 = vpop.f32.mrf.mxu2 }
  0xd2   : > { %vm570_vm2 = vcmp.gt.f32.partialorder %v566_v8, 0.0  ;;  %v571_v9 = vmul.f32 %v566_v8, %v533_v7 }
  0xd4   : > { %v572_v13 = vsel %vm570_vm2, %v566_v8, %v571_v9 }
  0xd5   : > { %v507_v11 = vpop.f32.mrf.mxu0  ;;  %v527_v12 = vpop.f32.mrf.mxu1  ;;  %v573_v16 = vadd.f32 %v572_v13, %v569_v10 }
  0xd6   : > { %v534_v14 = vmul.f32 %v533_v7, %v507_v11  ;;  %vm532_vm3 = vcmp.gt.f32.partialorder %v527_v12, 0.0  ;;  %v535_v15 = vmul.f32 %v533_v7, %v527_v12  ;;  %vm531_vm5 = vcmp.gt.f32.partialorder %v507_v11, 0.0 }
  0xd7   : > { %575 = vst.msk [vmem:[#allocation2 + $0x8] sm:$0xf] %vm574_vm4, %v573_v16 }
  0xd8   : > { %v537_v17 = vsel %vm532_vm3, %v527_v12, %v535_v15  ;;  %v536_v20 = vsel %vm531_vm5, %v507_v11, %v534_v14  ;;  %577 = vst.msk [vmem:[#allocation2 + $0x8] sm:$0xf] %vm576_vm6, %v1571_v21 }
  0xd9   : > { %v540_v19 = vrot.slane %v537_v17, 4  ;;  %v919_v17 = vstv %s1153_s22 }
  0xdb   : > { %v541_v22 = vsel %vm485_vm0, %v536_v20, %v540_v19 }
  0xdc   : > { %v543_v23 = vadd.f32 %v541_v22, %v530_v18 }
  0xde   : > { %611 = vst [vmem:[#allocation1] ss:$2 sm:$0xff] %v543_v23 }
  0xdf   : > { %v608_v24 = vld [vmem:[#allocation2 + $0x8] sm:$0xf] }
  0xe0   : > { %613 = vst [vmem:[#allocation1 + $0x10] ss:$2 sm:$0xff] %v608_v24  ;;  %v631_v27 = vld [vmem:[#allocation2 + $0x8] sm:$0xf] }
  0xe5   : > { %v614_v25 = vld.sshfl [vmem:[#allocation1] sm:$0xff pattern:$0x75316420]  ;;  %v615_v26 = vld.sshfl [vmem:[#allocation1 + $0x8] sm:$0xff pattern:$0x75316420] }
  0xe6   : > { %617 = vrot.lane.b32.xlu0 %v614_v25, %s1572_s11  ;;  %634 = vst [vmem:[#allocation1] ss:$2 sm:$0xff] %v543_v23 }
  0xe7   : > { %v616_v28 = vld.sshfl [vmem:[#allocation1 + $0x10] sm:$0xff pattern:$0x75316420] }
  0xe8   : > { %621 = vrot.lane.b32.xlu1 %v616_v28, %s1572_s11  ;;  %636 = vst [vmem:[#allocation1 + $0x10] ss:$2 sm:$0xff] %v631_v27 }
  0xed   : > { %v638_v29 = vld.sshfl [vmem:[#allocation1 + $0x8] sm:$0xff pattern:$0x75316420]  ;;  %v637_v30 = vld.sshfl [vmem:[#allocation1] sm:$0xff pattern:$0x75316420] }
  0xee   : > { %619 = vrot.lane.b32.xlu0 %v615_v26, %s1572_s11  ;;  %717 = vst [vmem:[#allocation1] ss:$2 sm:$0xff] %v543_v23 }
  0xef   : > { %v639_v31 = vld.sshfl [vmem:[#allocation1 + $0x10] sm:$0xff pattern:$0x75316420] }
  0xf0   : > { %642 = vrot.lane.b32.xlu1 %v638_v29, %s1573_s8  ;;  %644 = vrot.lane.b32.xlu2 %v639_v31, %s1573_s8  ;;  %780 = vst [vmem:[#allocation1 + $0x10] ss:$2 sm:$0xff] %v631_v27 }
  0xf5   : > { %v718_v32 = vld.sshfl [vmem:[#allocation1] sm:$0xff pattern:$0x75316420]  ;;  %v719_v33 = vld.sshfl [vmem:[#allocation1 + $0x8] sm:$0xff pattern:$0x75316420] }
  0xf6   : > { %774 = vrot.lane.b32.xlu0 %v653_v5, %s1574_s6  ;;  %1166 = vmatpush.msk.msrb.mxu1 %vm485_vm0, %v718_v32  ;;  %778 = vst [vmem:[#allocation1] ss:$2 sm:$0xff] %v543_v23 }
  0xf7   : > { %1169 = vmatpush.msk.msrb.mxu2 %vm485_vm0, %v719_v33  ;;  %1167 = vmatmul.msk.f32.vlgmr.msrb.gmra.mxu1 %vm481_vm1, %v653_v5  ;;  %v783_v36 = vld.sshfl [vmem:[#allocation1 + $0x10] sm:$0xff pattern:$0x75316420] }
  0xf8   : > { %1170 = vmatmul.msk.f32.vlgmr.msrb.gmra.mxu2 %vm481_vm1, %v653_v5  ;;  %851 = vrot.lane.b32.xlu1 %v653_v5, %s1575_s19 }
  0xfd   : > { %v782_v34 = vld.sshfl [vmem:[#allocation1 + $0x8] sm:$0xff pattern:$0x75316420]  ;;  %v781_v35 = vld.sshfl [vmem:[#allocation1] sm:$0xff pattern:$0x75316420] }
  0xfe   : > { %786 = vrot.lane.b32.xlu0 %v782_v34, %s1576_s7  ;;  %784 = vrot.lane.b32.xlu2 %v781_v35, %s1576_s7 }
  0xff   : > { %1168 = vmatmul.msk.f32.gmra.mxu1 %vm481_vm1, %v1788_v6 }
 0x100   : > { %1171 = vmatmul.msk.f32.gmra.mxu2 %vm481_vm1, %v1788_v6  ;;  %776 = vrot.lane.b32.xlu1 %v1788_v6, %s1574_s6 }
 0x106   : > { %640 = vrot.lane.b32.xlu0 %v637_v30, %s1573_s8  ;;  %788 = vrot.lane.b32.xlu2 %v783_v36, %s1576_s7 }
 0x10e   : > { %853 = vrot.lane.b32.xlu2 %v1788_v6, %s1575_s19 }
 0x14a   : > { %v645_v41 = vpop.permute.xlu2 %644 }
 0x158   : > { %v618_v43 = vpop.permute.xlu0 %617  ;;  %v785_v49 = vpop.permute.xlu2 %784 }
 0x15a   : > { %v622_v44 = vpop.permute.xlu1 %621 }
 0x160   : > { %v620_v50 = vpop.permute.xlu0 %619  ;;  %v789_v59 = vpop.permute.xlu2 %788 }
 0x161   : > { %v625_v51 = vsel %vm623_vm7, %v620_v50, %v622_v44  ;;  %v624_v52 = vsel %vm623_vm7, %v618_v43, %v620_v50 }
 0x162   : > { %v628_v53 = vsel %vm1807_vm9, 0.0, %v624_v52  ;;  %v629_v54 = vsel %vm1803_vm8, 0.0, %v625_v51  ;;  %v643_v55 = vpop.permute.xlu1 %642 }
 0x163   : > { %1160 = vmatpush.msk.msra.mxu3 %vm485_vm0, %v628_v53  ;;  %1163 = vmatpush.msk.msrb.mxu0 %vm485_vm0, %v629_v54  ;;  %v648_v56 = vsel %vm646_vm10, %v643_v55, %v645_v41 }
 0x164   : > { %1161 = vmatmul.msk.f32.vlgmr.msra.gmra.mxu3 %vm481_vm1, %v658_v39  ;;  %1164 = vmatmul.msk.f32.vlgmr.msrb.gmra.mxu0 %vm481_vm1, %v658_v39  ;;  %v652_v57 = vsel %vm1803_vm8, 0.0, %v648_v56 }
 0x165   : > { %1181 = vmatpush.msk.msra.mxu2 %vm485_vm0, %v652_v57 }
 0x168   : > { %v775_v58 = vpop.permute.xlu0 %774  ;;  %v854_v0 = vpop.permute.xlu2 %853 }
 0x16a   : > { %v852_v60 = vpop.permute.xlu1 %851 }
 0x16b   : > { %1182 = vmatmul.msk.f32.vlgmr.msra.gmra.mxu2 %vm481_vm1, %v852_v60 }
 0x16c   : > { %1162 = vmatmul.msk.f32.gmra.mxu3 %vm481_vm1, %v660_v37  ;;  %1165 = vmatmul.msk.f32.gmra.mxu0 %vm481_vm1, %v660_v37 }
 0x170   : > { %v787_v61 = vpop.permute.xlu0 %786 }
 0x171   : > { %v792_v62 = vsel %vm790_vm11, %v787_v61, %v789_v59  ;;  %v791_v63 = vsel %vm790_vm11, %v785_v49, %v787_v61 }
 0x172   : > { %1172 = vmatpush.msk.msrb.mxu3 %vm485_vm0, %v791_v63  ;;  %1175 = vmatpush.msk.msra.mxu0 %vm485_vm0, %v792_v62  ;;  %v777_v3 = vpop.permute.xlu1 %776 }
 0x173   : > { %1183 = vmatmul.msk.f32.gmra.mxu2 %vm481_vm1, %v854_v0 }
 0x174   : > { %1173 = vmatmul.msk.f32.vlgmr.msrb.gmra.mxu3 %vm481_vm1, %v775_v58  ;;  %1176 = vmatmul.msk.f32.vlgmr.msra.gmra.mxu0 %vm481_vm1, %v775_v58  ;;  %v745_v8 = vpop.f32.mrf.mxu1 }
 0x178   : > { %v641_v1 = vpop.permute.xlu0 %640 }
 0x179   : > { %v647_v2 = vsel %vm646_vm10, %v641_v1, %v643_v55 }
 0x17a   : > { %v651_v4 = vsel %vm1807_vm9, 0.0, %v647_v2 }
 0x17b   : > { %1178 = vmatpush.msk.msra.mxu1 %vm485_vm0, %v651_v4  ;;  %v768_v5 = vpop.f32.mrf.mxu2 }
 0x17c   : > { %1174 = vmatmul.msk.f32.gmra.mxu3 %vm481_vm1, %v777_v3  ;;  %1177 = vmatmul.msk.f32.gmra.mxu0 %vm481_vm1, %v777_v3  ;;  %v748_v15 = vpop.f32.mrf.mxu1 }
 0x17d   : > { %1179 = vmatmul.msk.f32.vlgmr.msra.gmra.mxu1 %vm481_vm1, %v852_v60 }
 0x183   : > { %v771_v9 = vpop.f32.mrf.mxu2 }
 0x185   : > { %1180 = vmatmul.msk.f32.gmra.mxu1 %vm481_vm1, %v854_v0 }
 0x1e1   : > { %v711_v6 = vpop.f32.mrf.mxu0 }
 0x1e2   : > { %v769_v12 = vadd.f32 %v768_v5, %v711_v6 }
 0x1e7   : > { %v688_v7 = vpop.f32.mrf.mxu3 }
 0x1e8   : > { %v746_v19 = vadd.f32 %v745_v8, %v688_v7 }
 0x1e9   : > { %v714_v10 = vpop.f32.mrf.mxu0 }
 0x1ea   : > { %v772_v22 = vadd.f32 %v771_v9, %v714_v10 }
 0x1ee   : > { %v905_v13 = vpop.f32.mrf.mxu2 }
 0x1ef   : > { %v691_v11 = vpop.f32.mrf.mxu3 }
 0x1f0   : > { %v749_v32 = vadd.f32 %v748_v15, %v691_v11 }
 0x1f1   : > { %v841_v14 = vpop.f32.mrf.mxu0 }
 0x1f2   : > { %v848_v16 = vadd.f32 %v841_v14, %v769_v12 }
 0x1f4   : > { %v912_v18 = vadd.f32 %v905_v13, %v848_v16 }
 0x1f6   : > { %vm916_vm12 = vcmp.gt.f32.partialorder %v912_v18, 0.0  ;;  %v921_v20 = vmul.f32 %v919_v17, %v912_v18  ;;  %v908_v26 = vpop.f32.mrf.mxu2 }
 0x1f7   : > { %v818_v21 = vpop.f32.mrf.mxu3 }
 0x1f8   : > { %v925_v23 = vsel %vm916_vm12, %v912_v18, %v921_v20  ;;  %v847_v24 = vadd.f32 %v818_v21, %v746_v19 }
 0x1f9   : > { %929 = vst [vmem:[%s469_s21 + $0x8] sm:$0xff] %v925_v23  ;;  %v844_v25 = vpop.f32.mrf.mxu0 }
 0x1fa   : > { %v850_v27 = vadd.f32 %v844_v25, %v772_v22  ;;  %v882_v28 = vpop.f32.mrf.mxu1 }
 0x1fb   : > { %v911_v29 = vadd.f32 %v882_v28, %v847_v24 }
 0x1fc   : > { %v914_v30 = vadd.f32 %v908_v26, %v850_v27 }
 0x1fd   : > { %vm915_vm13 = vcmp.gt.f32.partialorder %v911_v29, 0.0  ;;  %v920_v31 = vmul.f32 %v919_v17, %v911_v29 }
 0x1fe   : > { %vm918_vm14 = vcmp.gt.f32.partialorder %v914_v30, 0.0  ;;  %v923_v33 = vmul.f32 %v919_v17, %v914_v30 }
 0x1ff   : > { %v924_v34 = vsel %vm915_vm13, %v911_v29, %v920_v31  ;;  %v821_v35 = vpop.f32.mrf.mxu3 }
 0x200   : > { %928 = vst [vmem:[%s469_s21] sm:$0xff] %v924_v34  ;;  %v927_v36 = vsel %vm918_vm14, %v914_v30, %v923_v33  ;;  %v849_v37 = vadd.f32 %v821_v35, %v749_v32 }
 0x201   : > { %931 = vst [vmem:[%s469_s21 + $0x18] sm:$0xff] %v927_v36 }
 0x202   : > { %v885_v38 = vpop.f32.mrf.mxu1 }
 0x203   : > { %v913_v39 = vadd.f32 %v885_v38, %v849_v37 }
 0x205   : > { %vm917_vm15 = vcmp.gt.f32.partialorder %v913_v39, 0.0  ;;  %v922_v40 = vmul.f32 %v919_v17, %v913_v39 }
 0x207   : > { %v926_v41 = vsel %vm917_vm15, %v913_v39, %v922_v40 }
 0x208   : > { %930 = vst [vmem:[%s469_s21 + $0x10] sm:$0xff] %v926_v41 }
 0x209   : > { %1493 = shalt.err (!%p1490_p0)
}
 0x20a   : > { %s1577_s16 = smov 256   ;;  %s1578_s6 = smov 16  }
 0x20b   : > { %1208 = dma.vmem_to_hbm [thread:$0]  (%p1696_p5), %s948_s17, 512, %s950_s27, %s933_s13, %s1577_s16, %s1577_s16, %s1578_s6  }
 0x20c PF: > { %s1918_s19 = sld [smem:[#allocation21_spill]]  ;;  %p1231_p3 = pnand %p1134_p11, %p1664_p6 }
 0x20e   : > { %p1232_p7 = pneg %p1231_p3 }
 0x212   : > { %s964_s22 = sand.u32 1, %s1918_s19  }
 0x213   : > { %s965_s23 = scalar_lea.sflag [#allocation5], %s964_s22 }
 0x214   : > { %1539 = dma.done.wait (%p1232_p7), %s965_s23, 512  }
 0x215   : > { %1541 = vsyncadd (%p1232_p7), %s965_s23, 4294966784  ;;  %s30_s29 = sadd.s32 1, %s1564_s29   ;;  %s1920_s21 = sld [smem:[#allocation22_spill]] }
 0x216   : > { %p27_p9 = scmp.ge.s32.totalorder %s30_s29, 4   ;;  %s1921_s26 = sld [smem:[#allocation26_spill]] }
 0x217   : > { %s1922_s10 = sld [smem:[#allocation24_spill]]  ;;  %s1923_s24 = smov %s1548_s25 }
 0x218   : > { %s1925_s27 = smov %s1560_s28 }
 0x219   :  { %29 = sbr.rel (!%p27_p9) target bundleno = 15 (0xf), region = 142 }
 0x21b   : > { %s1924_s25 = smov %s1920_s21 }
 0x21d   : > { %s1926_s28 = smov %s1922_s10 }
 0x21e   :  { %971 = vsyncpa [#allocation4], 1 }
 0x21f   :  { %973 = vsyncpa [#allocation4 + $0x1], 1 }
 0x220   :  { %974 = vsyncpa [#allocation9], 1 }
 0x221   :  { %976 = vsyncpa [#allocation9 + $0x1], 1 }
 0x222   :  { %977 = vsyncpa [#allocation12], 1 }
 0x223   :  { %979 = vsyncpa [#allocation12 + $0x1], 1 }
 0x224   :  { %980 = vsyncpa [#allocation5], 1 }
 0x225   :  { %982 = vsyncpa [#allocation5 + $0x1], 1 }
 0x226   :  { %983 = vsyncpa [#allocation6], 1 }
 0x227   :  { %985 = vsyncpa [#allocation6 + $0x1], 1 }

</bundles_post_ra>
